<compile_context>
chip_gen: v5e
topology: v5e:2x2
jax: 0.10.0
libtpu: 0.0.40
codegen_flags: <defaults>
</compile_context>

<pallas_src>
import math

import jax
import jax.numpy as jnp
from jax import lax
from jax.experimental import pallas as pl
from jax.experimental.pallas import tpu as pltpu


# -----------------------------------------------------------------------------
# Fused kernel, grid=(B,):
#   x_ref     : (1, 3S, H) bf16   q|k|v stacked along the M axis
#   wq_ref    : (H, H)     bf16   Wq pre-transposed to (in, out)
#   bq_ref    : (1, H)     f32
#   wd_ref    : (H, H)     bf16   dense weight pre-transposed to (in, out)
#   bd_ref    : (1, H)     f32
#   out_ref   : (1, S, H)  f32    merged output (after dense)
#   score_ref : (1, num_heads, S, S) f32  attention probabilities
# -----------------------------------------------------------------------------
def _make_mha_kernel(num_heads: int, depth: int, seq_len: int):
    inv_scale = 1.0 / math.sqrt(depth)
    # q @ k^T without an explicit transpose: contract the last dim of both.
    trans_b = (((1,), (1,)), ((), ()))

    def kernel(x_ref, wq_ref, bq_ref, wd_ref, bd_ref, out_ref, score_ref):
        S = seq_len
        x = x_ref[0]                       # (3S, H) bf16
        wq = wq_ref[...]                   # (H, H)  bf16, (in, out) layout
        bq = bq_ref[...]                   # (1, H)  f32
        bd = bd_ref[...]                   # (1, H)  f32

        # ---- single fused QKV projection: one (3S,H)x(H,H) MXU matmul ---------
        proj = jnp.dot(x, wq, preferred_element_type=jnp.float32) + bq   # (3S,H) f32

        qp = proj[0 * S:1 * S]             # (S, H) f32  (sublane-aligned slices)
        kp = proj[1 * S:2 * S]
        vp = proj[2 * S:3 * S]

        # bf16 operands for the remaining MXU matmuls; accumulation stays f32.
        qb = qp.astype(jnp.bfloat16)
        kb = kp.astype(jnp.bfloat16)
        vb = vp.astype(jnp.bfloat16)

        ctx_heads = []
        score_heads = []
        # num_heads is small; static unroll is fine at these shapes. For S >= 128
        # move heads to a grid axis / lax.fori_loop to bound vreg live ranges.
        for h in range(num_heads):
            lo = h * depth
            # TODO(synk): for production depth < 128 these lane slices are masked
            # vreg ops; keep heads on a sublane/grid axis or pad depth to 128.
            qh = qb[:, lo:lo + depth]      # (S, depth) bf16
            kh = kb[:, lo:lo + depth]
            vh = vb[:, lo:lo + depth]

            logits = lax.dot_general(
                qh, kh, trans_b, preferred_element_type=jnp.float32) * inv_scale
            # TODO(synk): optional boolean `mask` (masked_fill(-inf) pre-softmax)
            # of the reference module is not wired up (reference default: None).
            m = jnp.max(logits, axis=-1, keepdims=True)
            e = jnp.exp(logits - m)
            denom = jnp.sum(e, axis=-1, keepdims=True)
            score = e / denom              # exact divide: rows sum to 1 (f32)

            ctx_heads.append(
                jnp.dot(score.astype(jnp.bfloat16), vh,
                        preferred_element_type=jnp.float32))   # (S, depth) f32
            score_heads.append(score)

        # One (nh, S, S) slab store per grid step instead of per-head stores.
        score_ref[0] = jnp.stack(score_heads, axis=0).astype(score_ref.dtype)

        # ---- single full-K dense projection: (S,H)x(H,H) ----------------------
        ctx = jnp.concatenate(ctx_heads, axis=-1).astype(jnp.bfloat16)   # (S, H)
        out = jnp.dot(ctx, wd_ref[...], preferred_element_type=jnp.float32) + bd
        out_ref[0] = out.astype(out_ref.dtype)

    return kernel


def multi_head_attention(q, k, v, params, *, num_heads):
    """q, k, v: (B, S, H) float32. Returns (output (B,S,H), score (B,nh,S,S))."""
    B, S, H = q.shape
    assert H % num_heads == 0
    depth = H // num_heads

    # Wrapper-side layout plumbing (zero in-kernel cost):
    #   * stack q/k/v along the M axis -> one projection matmul per grid step
    #   * pre-transpose PyTorch (out, in) weights to (in, out)
    #   * cast MXU operands to bf16 (also halves the HBM->VMEM input DMA)
    x_cat = jnp.concatenate([q, k, v], axis=1).astype(jnp.bfloat16)   # (B, 3S, H)
    wq_t = jnp.transpose(params["wq_w"]).astype(jnp.bfloat16)         # (H, H)
    wd_t = jnp.transpose(params["dense_w"]).astype(jnp.bfloat16)      # (H, H)
    bq = params["wq_b"].reshape(1, H).astype(jnp.float32)
    bd = params["dense_b"].reshape(1, H).astype(jnp.float32)

    # Advisory cost hint for XLA scheduling around the custom call.
    flops = B * (6 * S * H * H        # fused QKV projection
                 + 4 * S * S * H      # q·k^T and score·v over all heads
                 + 2 * S * H * H)     # dense projection
    bytes_accessed = (2 * B * 3 * S * H              # bf16 stacked qkv input
                      + 2 * 2 * H * H + 4 * 2 * H    # bf16 weights + f32 biases
                      + 4 * B * S * H                # f32 merged output
                      + 4 * B * num_heads * S * S)   # f32 score output
    cost = pl.CostEstimate(flops=flops,
                           transcendentals=B * num_heads * S * S,
                           bytes_accessed=bytes_accessed)

    kernel = _make_mha_kernel(num_heads, depth, S)

    out, score = pl.pallas_call(
        kernel,
        out_shape=(
            jax.ShapeDtypeStruct((B, S, H), jnp.float32),
            # TODO(synk): at production S, make the score output optional / bf16
            # and re-tile flash-style (grid over (B, heads, q-tiles)) — the
            # O(B*nh*S^2) score block dominates HBM traffic and v7x's 64 MiB VMEM.
            jax.ShapeDtypeStruct((B, num_heads, S, S), jnp.float32),
        ),
        grid_spec=pltpu.PrefetchScalarGridSpec(
            num_scalar_prefetch=0,
            grid=(B,),
            in_specs=[
                pl.BlockSpec((1, 3 * S, H), lambda b: (b, 0, 0)),   # stacked q|k|v
                pl.BlockSpec((H, H), lambda b: (0, 0)),             # Wq^T (in,out)
                pl.BlockSpec((1, H), lambda b: (0, 0)),             # bq
                pl.BlockSpec((H, H), lambda b: (0, 0)),             # Wd^T (in,out)
                pl.BlockSpec((1, H), lambda b: (0, 0)),             # bd
            ],
            out_specs=[
                pl.BlockSpec((1, S, H), lambda b: (b, 0, 0)),               # output
                pl.BlockSpec((1, num_heads, S, S), lambda b: (b, 0, 0, 0)),  # score
            ],
        ),
        compiler_params=pltpu.CompilerParams(
            dimension_semantics=("parallel",),
            vmem_limit_bytes=32 * 1024 * 1024,
        ),
        cost_estimate=cost,
    )(x_cat, wq_t, bq, wd_t, bd)
    return out, score


# ----------------------------- reference (pure JAX) --------------------------
def reference_forward(q, k, v, params, *, num_heads):
    B, S, H = q.shape
    depth = H // num_heads
    wq, bq = params["wq_w"], params["wq_b"]
    wd, bd = params["dense_w"], params["dense_b"]

    def split_head(x):
        return jnp.transpose(x.reshape(B, S, num_heads, depth), (0, 2, 1, 3))

    qh = split_head(q @ wq.T + bq)
    kh = split_head(k @ wq.T + bq)   # reference uses wq for k too
    vh = split_head(v @ wq.T + bq)   # and for v
    logits = jnp.einsum("bhqd,bhkd->bhqk", qh, kh) / jnp.sqrt(jnp.float32(depth))
    score = jax.nn.softmax(logits, axis=-1)
    out = jnp.einsum("bhqk,bhkd->bhqd", score, vh)
    out = jnp.transpose(out, (0, 2, 1, 3)).reshape(B, S, H)
    return out @ wd.T + bd, score


# ----------------------------------- main -------------------------------------
def xavier_uniform(key, out_dim, in_dim):
    limit = (6.0 / (in_dim + out_dim)) ** 0.5
    return jax.random.uniform(key, (out_dim, in_dim), jnp.float32, -limit, limit)


if __name__ == "__main__":
    B, S, H, NH = 2, 8, 32, 4   # batch, seq, hidden, num_heads (depth = 8)

    key = jax.random.PRNGKey(0)
    kq, kk, kv, kw1, kb1, kw2, kb2 = jax.random.split(key, 7)

    q = jax.random.normal(kq, (B, S, H), jnp.float32)
    k = jax.random.normal(kk, (B, S, H), jnp.float32)
    v = jax.random.normal(kv, (B, S, H), jnp.float32)

    bound = 1.0 / (H ** 0.5)
    params = {
        "wq_w": xavier_uniform(kw1, H, H),
        "wq_b": jax.random.uniform(kb1, (H,), jnp.float32, -bound, bound),
        "dense_w": xavier_uniform(kw2, H, H),
        "dense_b": jax.random.uniform(kb2, (H,), jnp.float32, -bound, bound),
    }

    out, score = multi_head_attention(q, k, v, params, num_heads=NH)
    out = jax.block_until_ready(out)
    score = jax.block_until_ready(score)

    ref_out, ref_score = reference_forward(q, k, v, params, num_heads=NH)
    assert out.shape == (B, S, H) and score.shape == (B, NH, S, S)
    # Tolerances account for deliberate bf16 MXU operands (per the perf review);
    # softmax itself is an exact f32 divide so score rows sum to 1.
    assert jnp.allclose(score, ref_score, atol=2e-2, rtol=2e-2)
    assert jnp.allclose(out, ref_out, atol=5e-2, rtol=5e-2)

    print("KERNEL_OK")
</pallas_src>

<mosaic_0001>
module attributes {stable_mosaic.version = 11 : i64} {
  func.func @kernel(%arg0: i32, %arg1: memref<1x24x32xbf16, #tpu.memory_space<vmem>>, %arg2: memref<32x32xbf16, #tpu.memory_space<vmem>>, %arg3: memref<1x32xf32, #tpu.memory_space<vmem>>, %arg4: memref<32x32xbf16, #tpu.memory_space<vmem>>, %arg5: memref<1x32xf32, #tpu.memory_space<vmem>>, %arg6: memref<1x8x32xf32, #tpu.memory_space<vmem>>, %arg7: memref<1x4x8x8xf32, #tpu.memory_space<vmem>>) attributes {dimension_semantics = [#tpu.dimension_semantics<parallel>], iteration_bounds = array<i64: 2>, scalar_prefetch = 0 : i64, scratch_operands = 0 : i64, tpu.core_type = #tpu.core_type<tc>, window_params = [{transform_indices = @transform_0, window_bounds = array<i64: 1, 24, 32>}, {pipeline_mode = #tpu.pipeline_mode<synchronous>, transform_indices = @transform_1, window_bounds = array<i64: 32, 32>}, {pipeline_mode = #tpu.pipeline_mode<synchronous>, transform_indices = @transform_2, window_bounds = array<i64: 1, 32>}, {pipeline_mode = #tpu.pipeline_mode<synchronous>, transform_indices = @transform_3, window_bounds = array<i64: 32, 32>}, {pipeline_mode = #tpu.pipeline_mode<synchronous>, transform_indices = @transform_4, window_bounds = array<i64: 1, 32>}, {transform_indices = @transform_5, window_bounds = array<i64: 1, 8, 32>}, {transform_indices = @transform_6, window_bounds = array<i64: 1, 4, 8, 8>}]} {
    %c0 = arith.constant 0 : index
    %c0_0 = arith.constant 0 : index
    %c0_1 = arith.constant 0 : index
    %0 = vector.load %arg1[%c0, %c0_0, %c0_1] : memref<1x24x32xbf16, #tpu.memory_space<vmem>>, vector<1x24x32xbf16>
    %1 = vector.shape_cast %0 : vector<1x24x32xbf16> to vector<24x32xbf16>
    %c0_2 = arith.constant 0 : index
    %c0_3 = arith.constant 0 : index
    %2 = vector.load %arg2[%c0_2, %c0_3] : memref<32x32xbf16, #tpu.memory_space<vmem>>, vector<32x32xbf16>
    %c0_4 = arith.constant 0 : index
    %c0_5 = arith.constant 0 : index
    %3 = vector.load %arg3[%c0_4, %c0_5] : memref<1x32xf32, #tpu.memory_space<vmem>>, vector<1x32xf32>
    %c0_6 = arith.constant 0 : index
    %c0_7 = arith.constant 0 : index
    %4 = vector.load %arg5[%c0_6, %c0_7] : memref<1x32xf32, #tpu.memory_space<vmem>>, vector<1x32xf32>
    %cst = arith.constant dense<0.000000e+00> : vector<24x32xf32>
    %5 = tpu.matmul %1, %2, %cst {dimension_numbers = #tpu.dot_dimension_numbers<[1], [0], [0], [1], [0, 0, 1, 1], [], []>} : vector<24x32xbf16>, vector<32x32xbf16>, vector<24x32xf32> -> vector<24x32xf32>
    %6 = vector.broadcast %3 : vector<1x32xf32> to vector<24x32xf32>
    %7 = arith.addf %5, %6 : vector<24x32xf32>
    %8 = vector.extract_strided_slice %7 {offsets = [0, 0], sizes = [8, 32], strides = [1, 1]} : vector<24x32xf32> to vector<8x32xf32>
    %9 = vector.extract_strided_slice %7 {offsets = [8, 0], sizes = [8, 32], strides = [1, 1]} : vector<24x32xf32> to vector<8x32xf32>
    %10 = vector.extract_strided_slice %7 {offsets = [16, 0], sizes = [8, 32], strides = [1, 1]} : vector<24x32xf32> to vector<8x32xf32>
    %11 = arith.truncf %8 : vector<8x32xf32> to vector<8x32xbf16>
    %12 = arith.truncf %9 : vector<8x32xf32> to vector<8x32xbf16>
    %13 = arith.truncf %10 : vector<8x32xf32> to vector<8x32xbf16>
    %14 = vector.extract_strided_slice %11 {offsets = [0, 0], sizes = [8, 8], strides = [1, 1]} : vector<8x32xbf16> to vector<8x8xbf16>
    %15 = vector.extract_strided_slice %12 {offsets = [0, 0], sizes = [8, 8], strides = [1, 1]} : vector<8x32xbf16> to vector<8x8xbf16>
    %16 = vector.extract_strided_slice %13 {offsets = [0, 0], sizes = [8, 8], strides = [1, 1]} : vector<8x32xbf16> to vector<8x8xbf16>
    %cst_8 = arith.constant dense<0.000000e+00> : vector<8x8xf32>
    %17 = tpu.matmul %14, %15, %cst_8 {dimension_numbers = #tpu.dot_dimension_numbers<[1], [1], [0], [0], [0, 0, 1, 0], [], []>} : vector<8x8xbf16>, vector<8x8xbf16>, vector<8x8xf32> -> vector<8x8xf32>
    %cst_9 = arith.constant 0.353553385 : f32
    %18 = vector.broadcast %cst_9 : f32 to vector<8x8xf32>
    %19 = arith.mulf %17, %18 : vector<8x8xf32>
    %cst_10 = arith.constant dense<0xFF800000> : vector<8xf32>
    %20 = vector.multi_reduction <maximumf>, %19, %cst_10 [1] : vector<8x8xf32> to vector<8xf32>
    %21 = vector.shape_cast %20 : vector<8xf32> to vector<8x1xf32>
    %22 = vector.broadcast %21 : vector<8x1xf32> to vector<8x8xf32>
    %23 = arith.subf %19, %22 : vector<8x8xf32>
    %24 = math.exp %23 : vector<8x8xf32>
    %cst_11 = arith.constant dense<0.000000e+00> : vector<8xf32>
    %25 = vector.multi_reduction <add>, %24, %cst_11 [1] : vector<8x8xf32> to vector<8xf32>
    %26 = vector.shape_cast %25 : vector<8xf32> to vector<8x1xf32>
    %27 = vector.broadcast %26 : vector<8x1xf32> to vector<8x8xf32>
    %28 = arith.divf %24, %27 : vector<8x8xf32>
    %29 = arith.truncf %28 : vector<8x8xf32> to vector<8x8xbf16>
    %cst_12 = arith.constant dense<0.000000e+00> : vector<8x8xf32>
    %30 = tpu.matmul %29, %16, %cst_12 {dimension_numbers = #tpu.dot_dimension_numbers<[1], [0], [0], [1], [0, 0, 1, 1], [], []>} : vector<8x8xbf16>, vector<8x8xbf16>, vector<8x8xf32> -> vector<8x8xf32>
    %31 = vector.extract_strided_slice %11 {offsets = [0, 8], sizes = [8, 8], strides = [1, 1]} : vector<8x32xbf16> to vector<8x8xbf16>
    %32 = vector.extract_strided_slice %12 {offsets = [0, 8], sizes = [8, 8], strides = [1, 1]} : vector<8x32xbf16> to vector<8x8xbf16>
    %33 = vector.extract_strided_slice %13 {offsets = [0, 8], sizes = [8, 8], strides = [1, 1]} : vector<8x32xbf16> to vector<8x8xbf16>
    %cst_13 = arith.constant dense<0.000000e+00> : vector<8x8xf32>
    %34 = tpu.matmul %31, %32, %cst_13 {dimension_numbers = #tpu.dot_dimension_numbers<[1], [1], [0], [0], [0, 0, 1, 0], [], []>} : vector<8x8xbf16>, vector<8x8xbf16>, vector<8x8xf32> -> vector<8x8xf32>
    %cst_14 = arith.constant 0.353553385 : f32
    %35 = vector.broadcast %cst_14 : f32 to vector<8x8xf32>
    %36 = arith.mulf %34, %35 : vector<8x8xf32>
    %cst_15 = arith.constant dense<0xFF800000> : vector<8xf32>
    %37 = vector.multi_reduction <maximumf>, %36, %cst_15 [1] : vector<8x8xf32> to vector<8xf32>
    %38 = vector.shape_cast %37 : vector<8xf32> to vector<8x1xf32>
    %39 = vector.broadcast %38 : vector<8x1xf32> to vector<8x8xf32>
    %40 = arith.subf %36, %39 : vector<8x8xf32>
    %41 = math.exp %40 : vector<8x8xf32>
    %cst_16 = arith.constant dense<0.000000e+00> : vector<8xf32>
    %42 = vector.multi_reduction <add>, %41, %cst_16 [1] : vector<8x8xf32> to vector<8xf32>
    %43 = vector.shape_cast %42 : vector<8xf32> to vector<8x1xf32>
    %44 = vector.broadcast %43 : vector<8x1xf32> to vector<8x8xf32>
    %45 = arith.divf %41, %44 : vector<8x8xf32>
    %46 = arith.truncf %45 : vector<8x8xf32> to vector<8x8xbf16>
    %cst_17 = arith.constant dense<0.000000e+00> : vector<8x8xf32>
    %47 = tpu.matmul %46, %33, %cst_17 {dimension_numbers = #tpu.dot_dimension_numbers<[1], [0], [0], [1], [0, 0, 1, 1], [], []>} : vector<8x8xbf16>, vector<8x8xbf16>, vector<8x8xf32> -> vector<8x8xf32>
    %48 = vector.extract_strided_slice %11 {offsets = [0, 16], sizes = [8, 8], strides = [1, 1]} : vector<8x32xbf16> to vector<8x8xbf16>
    %49 = vector.extract_strided_slice %12 {offsets = [0, 16], sizes = [8, 8], strides = [1, 1]} : vector<8x32xbf16> to vector<8x8xbf16>
    %50 = vector.extract_strided_slice %13 {offsets = [0, 16], sizes = [8, 8], strides = [1, 1]} : vector<8x32xbf16> to vector<8x8xbf16>
    %cst_18 = arith.constant dense<0.000000e+00> : vector<8x8xf32>
    %51 = tpu.matmul %48, %49, %cst_18 {dimension_numbers = #tpu.dot_dimension_numbers<[1], [1], [0], [0], [0, 0, 1, 0], [], []>} : vector<8x8xbf16>, vector<8x8xbf16>, vector<8x8xf32> -> vector<8x8xf32>
    %cst_19 = arith.constant 0.353553385 : f32
    %52 = vector.broadcast %cst_19 : f32 to vector<8x8xf32>
    %53 = arith.mulf %51, %52 : vector<8x8xf32>
    %cst_20 = arith.constant dense<0xFF800000> : vector<8xf32>
    %54 = vector.multi_reduction <maximumf>, %53, %cst_20 [1] : vector<8x8xf32> to vector<8xf32>
    %55 = vector.shape_cast %54 : vector<8xf32> to vector<8x1xf32>
    %56 = vector.broadcast %55 : vector<8x1xf32> to vector<8x8xf32>
    %57 = arith.subf %53, %56 : vector<8x8xf32>
    %58 = math.exp %57 : vector<8x8xf32>
    %cst_21 = arith.constant dense<0.000000e+00> : vector<8xf32>
    %59 = vector.multi_reduction <add>, %58, %cst_21 [1] : vector<8x8xf32> to vector<8xf32>
    %60 = vector.shape_cast %59 : vector<8xf32> to vector<8x1xf32>
    %61 = vector.broadcast %60 : vector<8x1xf32> to vector<8x8xf32>
    %62 = arith.divf %58, %61 : vector<8x8xf32>
    %63 = arith.truncf %62 : vector<8x8xf32> to vector<8x8xbf16>
    %cst_22 = arith.constant dense<0.000000e+00> : vector<8x8xf32>
    %64 = tpu.matmul %63, %50, %cst_22 {dimension_numbers = #tpu.dot_dimension_numbers<[1], [0], [0], [1], [0, 0, 1, 1], [], []>} : vector<8x8xbf16>, vector<8x8xbf16>, vector<8x8xf32> -> vector<8x8xf32>
    %65 = vector.extract_strided_slice %11 {offsets = [0, 24], sizes = [8, 8], strides = [1, 1]} : vector<8x32xbf16> to vector<8x8xbf16>
    %66 = vector.extract_strided_slice %12 {offsets = [0, 24], sizes = [8, 8], strides = [1, 1]} : vector<8x32xbf16> to vector<8x8xbf16>
    %67 = vector.extract_strided_slice %13 {offsets = [0, 24], sizes = [8, 8], strides = [1, 1]} : vector<8x32xbf16> to vector<8x8xbf16>
    %cst_23 = arith.constant dense<0.000000e+00> : vector<8x8xf32>
    %68 = tpu.matmul %65, %66, %cst_23 {dimension_numbers = #tpu.dot_dimension_numbers<[1], [1], [0], [0], [0, 0, 1, 0], [], []>} : vector<8x8xbf16>, vector<8x8xbf16>, vector<8x8xf32> -> vector<8x8xf32>
    %cst_24 = arith.constant 0.353553385 : f32
    %69 = vector.broadcast %cst_24 : f32 to vector<8x8xf32>
    %70 = arith.mulf %68, %69 : vector<8x8xf32>
    %cst_25 = arith.constant dense<0xFF800000> : vector<8xf32>
    %71 = vector.multi_reduction <maximumf>, %70, %cst_25 [1] : vector<8x8xf32> to vector<8xf32>
    %72 = vector.shape_cast %71 : vector<8xf32> to vector<8x1xf32>
    %73 = vector.broadcast %72 : vector<8x1xf32> to vector<8x8xf32>
    %74 = arith.subf %70, %73 : vector<8x8xf32>
    %75 = math.exp %74 : vector<8x8xf32>
    %cst_26 = arith.constant dense<0.000000e+00> : vector<8xf32>
    %76 = vector.multi_reduction <add>, %75, %cst_26 [1] : vector<8x8xf32> to vector<8xf32>
    %77 = vector.shape_cast %76 : vector<8xf32> to vector<8x1xf32>
    %78 = vector.broadcast %77 : vector<8x1xf32> to vector<8x8xf32>
    %79 = arith.divf %75, %78 : vector<8x8xf32>
    %80 = arith.truncf %79 : vector<8x8xf32> to vector<8x8xbf16>
    %cst_27 = arith.constant dense<0.000000e+00> : vector<8x8xf32>
    %81 = tpu.matmul %80, %67, %cst_27 {dimension_numbers = #tpu.dot_dimension_numbers<[1], [0], [0], [1], [0, 0, 1, 1], [], []>} : vector<8x8xbf16>, vector<8x8xbf16>, vector<8x8xf32> -> vector<8x8xf32>
    %82 = vector.shape_cast %28 : vector<8x8xf32> to vector<1x8x8xf32>
    %83 = vector.shape_cast %45 : vector<8x8xf32> to vector<1x8x8xf32>
    %84 = vector.shape_cast %62 : vector<8x8xf32> to vector<1x8x8xf32>
    %85 = vector.shape_cast %79 : vector<8x8xf32> to vector<1x8x8xf32>
    %86 = tpu.concatenate %82, %83, %84, %85 in 0 : vector<1x8x8xf32>, vector<1x8x8xf32>, vector<1x8x8xf32>, vector<1x8x8xf32> -> vector<4x8x8xf32>
    %c0_28 = arith.constant 0 : index
    %c0_29 = arith.constant 0 : index
    %c0_30 = arith.constant 0 : index
    %c0_31 = arith.constant 0 : index
    %87 = vector.load %arg7[%c0_28, %c0_29, %c0_30, %c0_31] : memref<1x4x8x8xf32, #tpu.memory_space<vmem>>, vector<1x4x8x8xf32>
    %88 = vector.shape_cast %87 : vector<1x4x8x8xf32> to vector<4x8x8xf32>
    %89 = vector.shape_cast %86 : vector<4x8x8xf32> to vector<1x4x8x8xf32>
    tpu.vector_store %arg7[%c0_28, %c0_29, %c0_30, %c0_31], %89 {strides = array<i32>} : memref<1x4x8x8xf32, #tpu.memory_space<vmem>>, vector<1x4x8x8xf32>,
    %90 = tpu.concatenate %30, %47, %64, %81 in 1 : vector<8x8xf32>, vector<8x8xf32>, vector<8x8xf32>, vector<8x8xf32> -> vector<8x32xf32>
    %91 = arith.truncf %90 : vector<8x32xf32> to vector<8x32xbf16>
    %c0_32 = arith.constant 0 : index
    %c0_33 = arith.constant 0 : index
    %92 = vector.load %arg4[%c0_32, %c0_33] : memref<32x32xbf16, #tpu.memory_space<vmem>>, vector<32x32xbf16>
    %cst_34 = arith.constant dense<0.000000e+00> : vector<8x32xf32>
    %93 = tpu.matmul %91, %92, %cst_34 {dimension_numbers = #tpu.dot_dimension_numbers<[1], [0], [0], [1], [0, 0, 1, 1], [], []>} : vector<8x32xbf16>, vector<32x32xbf16>, vector<8x32xf32> -> vector<8x32xf32>
    %94 = vector.broadcast %4 : vector<1x32xf32> to vector<8x32xf32>
    %95 = arith.addf %93, %94 : vector<8x32xf32>
    %c0_35 = arith.constant 0 : index
    %c0_36 = arith.constant 0 : index
    %c0_37 = arith.constant 0 : index
    %96 = vector.load %arg6[%c0_35, %c0_36, %c0_37] : memref<1x8x32xf32, #tpu.memory_space<vmem>>, vector<1x8x32xf32>
    %97 = vector.shape_cast %96 : vector<1x8x32xf32> to vector<8x32xf32>
    %98 = vector.shape_cast %95 : vector<8x32xf32> to vector<1x8x32xf32>
    tpu.vector_store %arg6[%c0_35, %c0_36, %c0_37], %98 {strides = array<i32>} : memref<1x8x32xf32, #tpu.memory_space<vmem>>, vector<1x8x32xf32>,
    return
  }
  func.func @transform_0(%arg0: i32) -> (i32, i32, i32) {
    %c0_i32 = arith.constant 0 : i32
    %c0_i32_0 = arith.constant 0 : i32
    %c0_i32_1 = arith.constant 0 : i32
    return %arg0, %c0_i32, %c0_i32_0 : i32, i32, i32
  }
  func.func @transform_1(%arg0: i32) -> (i32, i32) {
    %c0_i32 = arith.constant 0 : i32
    %c0_i32_0 = arith.constant 0 : i32
    %c0_i32_1 = arith.constant 0 : i32
    return %c0_i32, %c0_i32_0 : i32, i32
  }
  func.func @transform_2(%arg0: i32) -> (i32, i32) {
    %c0_i32 = arith.constant 0 : i32
    %c0_i32_0 = arith.constant 0 : i32
    %c0_i32_1 = arith.constant 0 : i32
    return %c0_i32, %c0_i32_0 : i32, i32
  }
  func.func @transform_3(%arg0: i32) -> (i32, i32) {
    %c0_i32 = arith.constant 0 : i32
    %c0_i32_0 = arith.constant 0 : i32
    %c0_i32_1 = arith.constant 0 : i32
    return %c0_i32, %c0_i32_0 : i32, i32
  }
  func.func @transform_4(%arg0: i32) -> (i32, i32) {
    %c0_i32 = arith.constant 0 : i32
    %c0_i32_0 = arith.constant 0 : i32
    %c0_i32_1 = arith.constant 0 : i32
    return %c0_i32, %c0_i32_0 : i32, i32
  }
  func.func @transform_5(%arg0: i32) -> (i32, i32, i32) {
    %c0_i32 = arith.constant 0 : i32
    %c0_i32_0 = arith.constant 0 : i32
    %c0_i32_1 = arith.constant 0 : i32
    return %arg0, %c0_i32, %c0_i32_0 : i32, i32, i32
  }
  func.func @transform_6(%arg0: i32) -> (i32, i32, i32, i32) {
    %c0_i32 = arith.constant 0 : i32
    %c0_i32_0 = arith.constant 0 : i32
    %c0_i32_1 = arith.constant 0 : i32
    %c0_i32_2 = arith.constant 0 : i32
    return %arg0, %c0_i32, %c0_i32_0, %c0_i32_1 : i32, i32, i32, i32
  }
}

</mosaic_0001>

<bundles_post_ra>
// kernel: tpu_custom_call.1
= control target key start
LH: loop header
LB: loop body
LE: loop exit
PB: predicated region body
PF: predicated region fallthrough
CT: control target
= control target key end

     0   :  { %s1511_s0 = inlined_call_operand.hbm [shape: bf16[2,24,32], index: 0, kind: input, shape index: {}]   ;;  %s1512_s1 = inlined_call_operand.hbm [shape: bf16[32,32], index: 1, kind: input, shape index: {}]   ;;  %s1513_s2 = inlined_call_operand.vmem [shape: f32[1,32], index: 2, kind: input, shape index: {}]   ;;  %s1514_s3 = inlined_call_operand.hbm [shape: bf16[32,32], index: 3, kind: input, shape index: {}]   ;;  %s1515_s4 = inlined_call_operand.vmem [shape: f32[1,32], index: 4, kind: input, shape index: {}]   ;;  %s1516_s5 = inlined_call_operand.hbm [shape: f32[2,8,32], index: 5, kind: output, shape index: {0}]   ;;  %s1517_s6 = inlined_call_operand.hbm [shape: f32[2,4,8,8], index: 6, kind: output, shape index: {1}]  }
   0x1   :  { %1520 = sst [smem:[#allocation15_spill]] %s1512_s1 }
   0x2   :  { %1521 = sst [smem:[#allocation16_spill]] %s1514_s3 }
   0x3   :  { %12 = vsyncpa [#allocation3], 0 }
   0x4   :  { %14 = vsyncpa [#allocation3 + $0x1], 0 }
   0x5   :  { %15 = vsyncpa [#allocation6], 0 }
   0x6   :  { %16 = vsyncpa [#allocation4], 0 }
   0x7   :  { %18 = vsyncpa [#allocation4 + $0x1], 0 }
   0x8   :  { %19 = vsyncpa [#allocation10], 0 }
   0x9   :  { %21 = vsyncpa [#allocation10 + $0x1], 0  ;;  %s1277_s21 = smov 0   ;;  %s1279_s22 = smov 0  }
   0xa   :  { %s1281_s23 = smov 0   ;;  %s1283_s24 = smov 0  }
   0xb LB: > { %s1298_s25 = sadd.s32 4294967295, %s1229_s24   ;;  %s880_s26 = sadd.s32 4294967294, %s1229_s24   ;;  %s1229_s24 = sphi %s1283_s24, %s1535_s24   ;;  %s1225_s23 = sphi %s1281_s23, %s1534_s23   ;;  %s1221_s22 = sphi %s1279_s22, %s1533_s22   ;;  %s1217_s21 = sphi %s1277_s21, %s1532_s21  }
   0xc   : > { %p47_p0 = scmp.ne.s32.totalorder %s1221_s22, %s1217_s21  ;;  %p48_p1 = scmp.eq.s32.totalorder %s1298_s25, 0 }
   0xd   : > { %p155_p2 = scmp.eq.s32.totalorder %s1298_s25, 1  ;;  %p161_p3 = scmp.eq.s32.totalorder %s880_s26, 1 }
   0xe   : > { %p1307_p4 = por %p48_p1, %p47_p0  ;;  %p881_p5 = scmp.ge.s32.totalorder %s1229_s24, 1 }
   0xf   : > { %p1312_p6 = por %p161_p3, %p47_p0  ;;  %p194_p7 = scmp.lt.s32.totalorder %s1229_s24, 3 }
  0x10   : > { %s1524_s1 = sld [smem:[#allocation15_spill]]  ;;  %s1231_s9 = smov [#allocation5]  }
  0x11   : > { %p1320_p8 = pnand %p881_p5, %p194_p7  ;;  %s207_s10 = sshll.u32 %s1231_s9, 4  ;;  %s208_s10 = int_to_ptr.vmem [resolvable:$true] %s207_s10 }
  0x12   : > { %s1526_s3 = sld [smem:[#allocation16_spill]]  ;;  %s1518_s14 = smov 64  }
  0x13   : > { %p952_p9 = pneg %p1320_p8  ;;  %s1519_s15 = smov 4  }
  0x14   : > { %s1234_s16 = smov [#allocation7]   ;;  %s1339_s18 = sadd.s32 1, %s1229_s24  }
  0x15   : > { %p953_p10 = pnand %p952_p9, %p48_p1  ;;  %s224_s17 = sshll.u32 %s1234_s16, 4  ;;  %s225_s17 = int_to_ptr.vmem [resolvable:$true] %s224_s17 }
  0x16   : > { %s205_s7 = sshll.u32 %s1524_s1, 4  ;;  %s34_s19 = sadd.s32 1, %s1225_s23  ;;  %s206_s7 = int_to_ptr.hbm [resolvable:$true] %s205_s7 }
  0x17   : > { %955 = dma.hbm_to_vmem [thread:$0]  (!%p953_p10), %s206_s7, 256, %s208_s10, [#allocation6], %s1518_s14, %s1518_s14, %s1519_s15  }
  0x18   : > { %s222_s13 = sshll.u32 %s1526_s3, 4  ;;  %s31_s20 = ssub.s32 %s1229_s24, %s1339_s18  ;;  %s223_s13 = int_to_ptr.hbm [resolvable:$true] %s222_s13 }
  0x19   : > { %958 = dma.hbm_to_vmem [thread:$0]  (!%p953_p10), %s223_s13, 256, %s225_s17, [#allocation6], %s1518_s14, %s1518_s14, %s1519_s15  }
  0x1a   : > { %p41_p12 = scmp.ne.s32.totalorder %s1225_s23, %s1221_s22  ;;  %p32_p13 = scmp.eq.s32.totalorder %s31_s20, 0 }
  0x1b   : > { %p42_p0 = scmp.eq.s32.totalorder %s1229_s24, 0  ;;  %p972_p5 = scmp.lt.s32.totalorder %s1229_s24, 2 }
  0x1c   : > { %p1349_p3 = por %p155_p2, %p41_p12  ;;  %s241_s30 = sand.u32 1, %s1225_s23  }
  0x1d   : > { %s1355_s29 = scalar_select %p32_p13, %s1225_s23, %s34_s19  }
  0x1e   : > { %p43_p7 = por %p42_p0, %p41_p12  ;;  %s935_s7 = smul.u32 12, %s241_s30 }
  0x1f   : > { %s936_s9 = smul.u32 12, %s1229_s24  ;;  %s242_s19 = scalar_lea.sflag [#allocation3], %s241_s30 }
  0x20   : > { %p1359_p9 = pnand %p972_p5, %p43_p7  ;;  %s245_s16 = scalar_lea.vmem [#allocation2], %s935_s7 }
  0x21   : > { %s250_s13 = scalar_lea.hbm %s1511_s0, %s936_s9  ;;  %s253_s17 = sshll.u32 %s245_s16, 4  ;;  %s254_s17 = int_to_ptr.vmem [resolvable:$true] %s253_s17 }
  0x22   : > { %s251_s20 = sshll.u32 %s250_s13, 4  ;;  %p1101_p10 = pneg %p1359_p9  ;;  %s252_s20 = int_to_ptr.hbm [resolvable:$true] %s251_s20 }
  0x23   : > { %s1097_s14 = sshra.s32 %s252_s20, 4  ;;  %s1104_s11 = scalar_lea.hbm %s1511_s0, 24  ;;  %s1098_s14 = int_to_ptr.hbm [resolvable:$true] %s1097_s14 }
  0x24   : > { %s1099_s15 = scalar_lea.hbm %s1098_s14, 12  ;;  %p1105_p0 = scmp.lt.s32.totalorder %s1098_s14, %s1511_s0 }
  0x25   : > { %p1100_p2 = scmp.ne.s32.totalorder %s1098_s14, %s1099_s15  ;;  %p1106_p5 = scmp.lt.s32.totalorder %s1104_s11, %s1099_s15 }
  0x27   : > { %p1102_p12 = pnand %p1101_p10, %p1100_p2  ;;  %p1107_p7 = por %p1106_p5, %p1105_p0 }
  0x29   : > { %p1103_p13 = pneg %p1102_p12 }
  0x2b   : > { %p1108_p11 = pnand %p1107_p7, %p1103_p13 }
  0x2d   : > { %1111 = shalt.err (!%p1108_p11)
}
  0x2e   : > { %s1529_s30 = smov 4   ;;  %s1530_s7 = smov 64  }
  0x2f   : > { %962 = dma.hbm_to_vmem [thread:$0]  (!%p1359_p9), %s252_s20, 192, %s254_s17, %s242_s19, %s1530_s7, %s1530_s7, %s1529_s30  }
  0x30   : > { %265 = sbr.rel (%p1320_p8) target bundleno = 1523 (0x5f3), region = 40  ;;  %s1382_s1 = sand.u32 (!%p1320_p8), 1, %s1221_s22  }
  0x31   : > { %s937_s3 = smul.u32 (!%p1320_p8), 12, %s1382_s1  ;;  %s268_s14 = scalar_lea.sflag (!%p1320_p8), [#allocation3], %s1382_s1 }
  0x33   : > { %s271_s15 = scalar_lea.vmem (!%p1320_p8), [#allocation2], %s937_s3 }
  0x35   : > { %1200 = dma.done.wait (%p1307_p4), %s268_s14, 192  }
  0x36   : > { %1202 = vsyncadd (%p1307_p4), %s268_s14, 4294967104 }
  0x37   : > { %1204 = dma.done.wait (%p48_p1), [#allocation6], 512  }
  0x38   : > { %1206 = vsyncadd (%p48_p1), [#allocation6], 4294966784  ;;  %v931_v0 = vld [vmem:[#allocation5 + $0x8] sm:$0xff]  ;;  %v930_v1 = vld [vmem:[#allocation5] sm:$0xff]  ;;  %vm349_vm0 = vcmask 261120   ;;  %vm377_vm1 = vcmask 64512  }
  0x39   : > { %362 = vmatpush.bf16.msra.mxu0 %v931_v0  ;;  %v929_v2 = vld [vmem:[%s271_s15] sm:$0xff]  ;;  %v319_v3 = vld [vmem:[%s271_s15 + $0x8] sm:$0xf]  ;;  %s1235_s10 = smov 120   ;;  %s1236_s13 = smov 112   ;;  %vm426_vm2 = vcmask 1043456  }
  0x3a   : > { %v334_v4 = vunpack.c.l.b16 %v319_v3  ;;  %v1019_v7 = vld [vmem:[%s1513_s2] ss:$0 sm:$0xff]  ;;  %s1237_s16 = smov 104   ;;  %s890_s17 = sshll.u32 %s1382_s1, 5 }
  0x3b   : > { %s1419_s20 = scalar_lea.vmem [#allocation9], %s890_s17  ;;  %s1238_s19 = smov 8  }
  0x3c   : > { %v336_v5 = vpack.c.b16 %v334_v4, %v334_v4  ;;  %s1239_s11 = smov 16   ;;  %s1240_s12 = smov 24  }
  0x3d   : > { %363 = vmatpush.bf16.msra.mxu0 %v930_v1  ;;  %s934_s9 = sshll.u32 %s1298_s25, 5  ;;  %s752_s14 = sshll.u32 %s1419_s20, 4  ;;  %s753_s14 = int_to_ptr.vmem [resolvable:$true] %s752_s14 }
  0x3e   : > { %s751_s3 = scalar_lea.hbm %s1517_s6, %s934_s9  ;;  %s726_s27 = scalar_lea.sflag [#allocation10], %s1382_s1 }
  0x3f   : > { %s754_s15 = sshll.u32 %s751_s3, 4  ;;  %s1147_s17 = scalar_lea.hbm %s1517_s6, 64  ;;  %s755_s15 = int_to_ptr.hbm [resolvable:$true] %s754_s15 }
  0x40   : > { %903 = vmatmul.msk.bf16.vlgmr.msra.gmra.mxu0 %vm349_vm0, %v929_v2  ;;  %s1141_s8 = sshra.s32 %s755_s15, 4  ;;  %s1142_s8 = int_to_ptr.hbm [resolvable:$true] %s1141_s8 }
  0x41   : > { %p1148_p11 = scmp.lt.s32.totalorder %s1142_s8, %s1517_s6 }
  0x50   : > { %904 = vmatmul.msk.bf16.gmra.mxu0 %vm349_vm0, %v336_v5 }
  0xbd   : > { %v365_v6 = vpop.f32.mrf.mxu0 }
  0xbe   : > { %v366_v10 = vadd.f32 %v1019_v7, %v365_v6 }
  0xc0   : > { %v374_v14 = vpack.c.bf16 %v366_v10, %v366_v10 }
  0xc2   : > { %v444_v18 = vunpack.c.l.b16 %v374_v14 }
  0xc4   : > { %v445_v20 = vpack.c.b16 %v444_v18, %v444_v18 }
  0xc5   : > { %v367_v8 = vpop.f32.mrf.mxu0 }
  0xc6   : > { %v368_v9 = vadd.f32 %v1019_v7, %v367_v8 }
  0xc8   : > { %v375_v11 = vpack.c.bf16 %v368_v9, %v368_v9 }
  0xca   : > { %v449_v12 = vunpack.c.l.b16 %v375_v11  ;;  %v382_v13 = vsel %vm377_vm1, %v375_v11, 0 }
  0xcb   : > { %391 = vmatpush.bf16.xpose.msra.mxu1 %v382_v13 }
  0xcc   : > { %v1400_v15 = vpack.c.b16 %v449_v12, %v449_v12 }
  0xcd   : > { %v370_v16 = vpop.f32.mrf.mxu0 }
  0xce   : > { %451 = vrot.lane.b32.xlu0 %v1400_v15, %s1235_s10  ;;  %v371_v17 = vadd.f32 %v1019_v7, %v370_v16 }
  0xd0   : > { %v376_v19 = vpack.c.bf16 %v371_v17, %v371_v17 }
  0xd2   : > { %905 = vmatmul.msk.bf16.vlgmr.msra.gmra.mxu1 %vm377_vm1, %v374_v14  ;;  %v499_v22 = vunpack.c.l.b16 %v376_v19  ;;  %v428_v40 = vsel %vm426_vm2, %v376_v19, 0 }
  0xd3   : > { %437 = vmatpush.bf16.msra.mxu2 %v428_v40 }
  0xd4   : > { %v1404_v23 = vpack.c.b16 %v499_v22, %v499_v22 }
  0xd5   : > { %v372_v21 = vpop.f32.mrf.mxu0 }
  0xd6   : > { %446 = vrot.lane.b32.xlu0 %v445_v20, %s1235_s10 }
  0xde   : > { %501 = vrot.lane.b32.xlu0 %v1404_v23, %s1235_s10  ;;  %s1143_s10 = scalar_lea.hbm %s1142_s8, 32 }
  0xdf   : > { %p1144_p1 = scmp.ne.s32.totalorder %s1142_s8, %s1143_s10  ;;  %p1149_p9 = scmp.lt.s32.totalorder %s1147_s17, %s1143_s10 }
  0xe1   : > { %p1145_p4 = pnand %p1144_p1, %p1349_p3  ;;  %p1150_p2 = por %p1149_p9, %p1148_p11 }
  0xe3   : > { %p1146_p8 = pneg %p1145_p4 }
  0xe5   : > { %p1151_p10 = pnand %p1150_p2, %p1146_p8 }
  0xe6   : > { %522 = vrot.lane.b32.xlu0 %v445_v20, %s1236_s13 }
  0xee   : > { %592 = vrot.lane.b32.xlu0 %v445_v20, %s1237_s16 }
 0x140   : > { %v452_v24 = vpop.permute.xlu0 %451 }
 0x141   : > { %v457_v25 = vsel %vm377_vm1, %v452_v24, 0 }
 0x142   : > { %466 = vmatpush.bf16.xpose.msra.mxu3 %v457_v25 }
 0x148   : > { %v447_v26 = vpop.permute.xlu0 %446 }
 0x149   : > { %907 = vmatmul.msk.bf16.vlgmr.msra.gmra.mxu3 %vm377_vm1, %v447_v26 }
 0x14f   : > { %v393_v27 = vpop.f32.mrf.mxu1 }
 0x150   : > { %v397_v28 = vmul.f32 0.35355338, %v393_v27  ;;  %v502_v58 = vpop.permute.xlu0 %501 }
 0x151   : > { %v507_v63 = vsel %vm426_vm2, %v502_v58, 0 }
 0x152   : > { %v398_v29 = vsel %vm377_vm1, %v397_v28, -inf  ;;  %516 = vmatpush.bf16.msrb.mxu2 %v507_v63 }
 0x153   : > { %399 = vmax.xlane.f32.xlu1 %v398_v29 }
 0x157   : > { %v395_v30 = vpop.f32.mrf.mxu1 }
 0x158   : > { %v523_v62 = vpop.permute.xlu0 %522 }
 0x160   : > { %v593_v20 = vpop.permute.xlu0 %592 }
 0x1c6   : > { %v400_v31 = vpop.xlane.xlu1 %399 }
 0x1c7   : > { %v401_v32 = vsub.f32 %v397_v28, %v400_v31 }
 0x1c9   : > { %v402_v33 = vmul.f32 1.442695, %v401_v32 }
 0x1cb   : > { %1021 = vpow2.f32 %v402_v33 }
 0x1cc   : > { %v468_v34 = vpop.f32.mrf.mxu3 }
 0x1cd   : > { %v472_v35 = vmul.f32 0.35355338, %v468_v34 }
 0x1cf   : > { %v473_v36 = vsel %vm377_vm1, %v472_v35, -inf }
 0x1d0   : > { %474 = vmax.xlane.f32.xlu1 %v473_v36 }
 0x1d1   : > { %v1022_v37 = vpop.eup %1021 }
 0x1d2   : > { %v404_v38 = vsel %vm377_vm1, %v1022_v37, 0.0 }
 0x1d3   : > { %405 = vadd.xlane.f32.xlu2 %v404_v38 }
 0x1d4   : > { %v470_v39 = vpop.f32.mrf.mxu3 }
 0x1e9   : > { %524 = vrot.lane.b32.xlu1 %v1400_v15, %s1236_s13 }
 0x243   : > { %v475_v41 = vpop.xlane.xlu1 %474 }
 0x244   : > { %v476_v42 = vsub.f32 %v472_v35, %v475_v41 }
 0x246   : > { %v477_v43 = vmul.f32 1.442695, %v476_v42  ;;  %v406_v44 = vpop.xlane.xlu2 %405 }
 0x247   : > { %1023 = vrcp.f32 %v406_v44  ;;  %v418_v50 = vand.u32 2147483648, %v406_v44  ;;  %v416_v52 = vand.u32 2147483647, %v406_v44  ;;  %vm412_vm4 = vweird.f32 %v406_v44 }
 0x248   : > { %1025 = vpow2.f32 %v477_v43 }
 0x249   : > { %v419_v54 = vor.u32 1.1754944e-38, %v418_v50  ;;  %vm417_vm6 = vcmp.eq.f32.partialorder %v416_v52, 8.507059e+37 }
 0x24d   : > { %v1024_v45 = vpop.eup %1023 }
 0x24e   : > { %v1026_v46 = vpop.eup %1025  ;;  %v408_v47 = vmul.f32 %v1024_v45, %v406_v44  ;;  %vm413_vm3 = vweird.f32 %v1024_v45 }
 0x24f   : > { %v479_v48 = vsel %vm377_vm1, %v1026_v46, 0.0  ;;  %vm414_vm5 = vmor %vm412_vm4, %vm413_vm3 }
 0x250   : > { %v409_v49 = vsub.f32 1.0, %v408_v47  ;;  %480 = vadd.xlane.f32.xlu2 %v479_v48 }
 0x252   : > { %v410_v51 = vmul.f32 %v1024_v45, %v409_v49 }
 0x254   : > { %v411_v53 = vadd.f32 %v1024_v45, %v410_v51 }
 0x256   : > { %v415_v55 = vsel %vm414_vm5, %v1024_v45, %v411_v53  ;;  %vm679_vm5 = vcmask 130048  }
 0x257   : > { %v420_v56 = vsel %vm417_vm6, %v419_v54, %v415_v55  ;;  %vm681_vm6 = vcmask 195584  }
 0x258   : > { %v421_v57 = vmul.f32 %v1022_v37, %v420_v56 }
 0x25a   : > { %v422_v59 = vpack.c.bf16 %v421_v57, %v421_v57  ;;  %662 = vst.msk [vmem:[%s1419_s20] sm:$0xff] %vm377_vm1, %v421_v57 }
 0x25b   : > { %v525_v60 = vpop.permute.xlu1 %524 }
 0x25c   : > { %906 = vmatmul.msk.bf16.vlgmr.msra.gmra.mxu2 %vm377_vm1, %v422_v59  ;;  %v530_v61 = vsel %vm377_vm1, %v525_v60, 0 }
 0x25d   : > { %539 = vmatpush.bf16.xpose.msrb.mxu1 %v530_v61 }
 0x264   : > { %909 = vmatmul.msk.bf16.vlgmr.msrb.gmra.mxu1 %vm377_vm1, %v523_v62 }
 0x268   : > { %594 = vrot.lane.b32.xlu2 %v1400_v15, %s1237_s16 }
 0x2c3   : > { %v481_v0 = vpop.xlane.xlu2 %480 }
 0x2c4   : > { %1027 = vrcp.f32 %v481_v0  ;;  %v493_v6 = vand.u32 2147483648, %v481_v0  ;;  %v491_v8 = vand.u32 2147483647, %v481_v0  ;;  %vm487_vm8 = vweird.f32 %v481_v0 }
 0x2c6   : > { %v494_v10 = vor.u32 1.1754944e-38, %v493_v6  ;;  %vm492_vm10 = vcmp.eq.f32.partialorder %v491_v8, 8.507059e+37  ;;  %v933_v6 = vld [vmem:[#allocation7 + $0x8] sm:$0xff] }
 0x2c7   : > { %712 = vmatpush.bf16.msra.mxu1 %v933_v6 }
 0x2ca   : > { %v1028_v1 = vpop.eup %1027 }
 0x2cb   : > { %v483_v2 = vmul.f32 %v1028_v1, %v481_v0  ;;  %v595_v3 = vpop.permute.xlu2 %594  ;;  %vm488_vm7 = vweird.f32 %v1028_v1 }
 0x2cc   : > { %v600_v4 = vsel %vm377_vm1, %v595_v3, 0  ;;  %vm489_vm9 = vmor %vm487_vm8, %vm488_vm7 }
 0x2cd   : > { %v484_v5 = vsub.f32 1.0, %v483_v2  ;;  %609 = vmatpush.bf16.xpose.msra.mxu2 %v600_v4 }
 0x2cf   : > { %v485_v7 = vmul.f32 %v1028_v1, %v484_v5 }
 0x2d1   : > { %v486_v9 = vadd.f32 %v1028_v1, %v485_v7  ;;  %v932_v7 = vld [vmem:[#allocation7] sm:$0xff] }
 0x2d2   : > { %713 = vmatpush.bf16.msra.mxu1 %v932_v7 }
 0x2d3   : > { %v490_v11 = vsel %vm489_vm9, %v1028_v1, %v486_v9 }
 0x2d4   : > { %v495_v12 = vsel %vm492_vm10, %v494_v10, %v490_v11 }
 0x2d5   : > { %v496_v13 = vmul.f32 %v1026_v46, %v495_v12 }
 0x2d7   : > { %v497_v14 = vpack.c.bf16 %v496_v13, %v496_v13  ;;  %663 = vst.msk [vmem:[%s1419_s20 + $0x8] sm:$0xff] %vm377_vm1, %v496_v13 }
 0x2d9   : > { %908 = vmatmul.msk.bf16.vlgmr.msrb.gmra.mxu2 %vm377_vm1, %v497_v14 }
 0x2df   : > { %v1433_v15 = vpop.f32.mrf.mxu2 }
 0x2e1   : > { %v541_v16 = vpop.f32.mrf.mxu1 }
 0x2e2   : > { %v545_v17 = vmul.f32 0.35355338, %v541_v16 }
 0x2e4   : > { %v546_v18 = vsel %vm377_vm1, %v545_v17, -inf }
 0x2e5   : > { %547 = vmax.xlane.f32.xlu0 %v546_v18 }
 0x2e7   : > { %v441_v19 = vpop.f32.mrf.mxu2 }
 0x2e9   : > { %v543_v21 = vpop.f32.mrf.mxu1  ;;  %911 = vmatmul.msk.bf16.vlgmr.msra.gmra.mxu2 %vm377_vm1, %v593_v20 }
 0x2f9   : > { %571 = vrot.lane.b32.xlu0 %v1404_v23, %s1236_s13 }
 0x358   : > { %v548_v22 = vpop.xlane.xlu0 %547 }
 0x359   : > { %v549_v24 = vsub.f32 %v545_v17, %v548_v22 }
 0x35b   : > { %v550_v25 = vmul.f32 1.442695, %v549_v24 }
 0x35c   : > { %v518_v26 = vpop.f32.mrf.mxu2 }
 0x35d   : > { %1029 = vpow2.f32 %v550_v25 }
 0x363   : > { %v1030_v27 = vpop.eup %1029 }
 0x364   : > { %v520_v28 = vpop.f32.mrf.mxu2  ;;  %v552_v29 = vsel %vm377_vm1, %v1030_v27, 0.0 }
 0x365   : > { %553 = vadd.xlane.f32.xlu1 %v552_v29 }
 0x36b   : > { %v572_v30 = vpop.permute.xlu0 %571 }
 0x36c   : > { %v611_v31 = vpop.f32.mrf.mxu2  ;;  %v577_v32 = vsel %vm426_vm2, %v572_v30, 0 }
 0x36d   : > { %v615_v33 = vmul.f32 0.35355338, %v611_v31  ;;  %586 = vmatpush.bf16.msrb.mxu3 %v577_v32 }
 0x36f   : > { %v616_v34 = vsel %vm377_vm1, %v615_v33, -inf }
 0x370   : > { %617 = vmax.xlane.f32.xlu2 %v616_v34 }
 0x374   : > { %v613_v35 = vpop.f32.mrf.mxu2 }
 0x37e   : > { %641 = vrot.lane.b32.xlu1 %v1404_v23, %s1237_s16 }
 0x3d8   : > { %v554_v36 = vpop.xlane.xlu1 %553 }
 0x3d9   : > { %1031 = vrcp.f32 %v554_v36  ;;  %v566_v40 = vand.u32 2147483648, %v554_v36  ;;  %v564_v43 = vand.u32 2147483647, %v554_v36  ;;  %vm560_vm12 = vweird.f32 %v554_v36 }
 0x3db   : > { %v567_v47 = vor.u32 1.1754944e-38, %v566_v40  ;;  %vm565_vm14 = vcmp.eq.f32.partialorder %v564_v43, 8.507059e+37 }
 0x3df   : > { %v1032_v37 = vpop.eup %1031 }
 0x3e0   : > { %v556_v38 = vmul.f32 %v1032_v37, %v554_v36  ;;  %vm561_vm11 = vweird.f32 %v1032_v37 }
 0x3e1   : > { %vm562_vm13 = vmor %vm560_vm12, %vm561_vm11 }
 0x3e2   : > { %v557_v39 = vsub.f32 1.0, %v556_v38 }
 0x3e3   : > { %v618_v41 = vpop.xlane.xlu2 %617 }
 0x3e4   : > { %v558_v42 = vmul.f32 %v1032_v37, %v557_v39  ;;  %v619_v44 = vsub.f32 %v615_v33, %v618_v41 }
 0x3e6   : > { %v559_v45 = vadd.f32 %v1032_v37, %v558_v42  ;;  %v620_v46 = vmul.f32 1.442695, %v619_v44 }
 0x3e8   : > { %v563_v48 = vsel %vm562_vm13, %v1032_v37, %v559_v45  ;;  %1033 = vpow2.f32 %v620_v46 }
 0x3e9   : > { %v568_v23 = vsel %vm565_vm14, %v567_v47, %v563_v48 }
 0x3ea   : > { %v569_v49 = vmul.f32 %v1030_v27, %v568_v23 }
 0x3ec   : > { %v570_v50 = vpack.c.bf16 %v569_v49, %v569_v49  ;;  %664 = vst.msk [vmem:[%s1419_s20 + $0x10] sm:$0xff] %vm377_vm1, %v569_v49 }
 0x3ee   : > { %v1034_v51 = vpop.eup %1033  ;;  %910 = vmatmul.msk.bf16.vlgmr.msrb.gmra.mxu3 %vm377_vm1, %v570_v50 }
 0x3ef   : > { %v622_v52 = vsel %vm377_vm1, %v1034_v51, 0.0 }
 0x3f0   : > { %623 = vadd.xlane.f32.xlu2 %v622_v52  ;;  %v642_v53 = vpop.permute.xlu1 %641 }
 0x3f1   : > { %v647_v54 = vsel %vm426_vm2, %v642_v53, 0 }
 0x3f2   : > { %656 = vmatpush.bf16.msrb.mxu0 %v647_v54 }
 0x408   : > { %667 = vrot.lane.b32.xlu2 %v518_v26, %s1238_s19 }
 0x463   : > { %v624_v55 = vpop.xlane.xlu2 %623 }
 0x464   : > { %1035 = vrcp.f32 %v624_v55  ;;  %v636_v59 = vand.u32 2147483648, %v624_v55  ;;  %v634_v61 = vand.u32 2147483647, %v624_v55  ;;  %vm630_vm3 = vweird.f32 %v624_v55 }
 0x466   : > { %v637_v0 = vor.u32 1.1754944e-38, %v636_v59  ;;  %vm635_vm2 = vcmp.eq.f32.partialorder %v634_v61, 8.507059e+37 }
 0x46a   : > { %v1036_v56 = vpop.eup %1035 }
 0x46b   : > { %v626_v57 = vmul.f32 %v1036_v56, %v624_v55  ;;  %vm631_vm15 = vweird.f32 %v1036_v56  ;;  %v668_v10 = vpop.permute.xlu2 %667 }
 0x46c   : > { %vm632_vm4 = vmor %vm630_vm3, %vm631_vm15  ;;  %v678_v12 = vsel %vm377_vm1, %v1433_v15, %v668_v10 }
 0x46d   : > { %v627_v58 = vsub.f32 1.0, %v626_v57 }
 0x46f   : > { %v628_v60 = vmul.f32 %v1036_v56, %v627_v58 }
 0x471   : > { %v629_v62 = vadd.f32 %v1036_v56, %v628_v60  ;;  %v588_v63 = vpop.f32.mrf.mxu3 }
 0x472   : > { %671 = vrot.lane.b32.xlu0 %v588_v63, %s1239_s11 }
 0x473   : > { %v633_v1 = vsel %vm632_vm4, %v1036_v56, %v629_v62 }
 0x474   : > { %v638_v2 = vsel %vm635_vm2, %v637_v0, %v633_v1 }
 0x475   : > { %v639_v3 = vmul.f32 %v1034_v51, %v638_v2 }
 0x477   : > { %v640_v4 = vpack.c.bf16 %v639_v3, %v639_v3  ;;  %665 = vst.msk [vmem:[%s1419_s20 + $0x18] sm:$0xff] %vm377_vm1, %v639_v3 }
 0x479   : > { %v590_v5 = vpop.f32.mrf.mxu3  ;;  %912 = vmatmul.msk.bf16.vlgmr.msrb.gmra.mxu0 %vm377_vm1, %v640_v4 }
 0x4e4   : > { %v672_v11 = vpop.permute.xlu0 %671 }
 0x4e5   : > { %v680_v13 = vsel %vm679_vm5, %v678_v12, %v672_v11 }
 0x4f6   : > { %v658_v8 = vpop.f32.mrf.mxu0 }
 0x4f7   : > { %675 = vrot.lane.b32.xlu1 %v658_v8, %s1240_s12 }
 0x4fe   : > { %v660_v9 = vpop.f32.mrf.mxu0 }
 0x569   : > { %v676_v14 = vpop.permute.xlu1 %675 }
 0x56a   : > { %v682_v16 = vsel %vm681_vm6, %v680_v13, %v676_v14 }
 0x56b   : > { %v683_v17 = vpack.c.bf16 %v682_v16, %v682_v16 }
 0x56d   : > { %921 = vmatmul.msk.bf16.vlgmr.msra.gmra.mxu1 %vm349_vm0, %v683_v17 }
 0x56e   : > { %1154 = shalt.err (!%p1151_p10)
}
 0x56f   : > { %s1241_s20 = smov 128   ;;  %s924_s9 = sshll.u32 %s1298_s25, 3  ;;  %v1020_v15 = vld [vmem:[%s1515_s4] ss:$0 sm:$0xff] }
 0x570   : > { %949 = dma.vmem_to_hbm [thread:$0]  (%p1349_p3), %s753_s14, 512, %s755_s15, %s726_s27, %s1241_s20, %s1241_s20, %s1238_s19  }
 0x571   : > { %s889_s30 = sshll.u32 %s1382_s1, 3  ;;  %s736_s13 = scalar_lea.hbm %s1516_s5, %s924_s9 }
 0x572   : > { %s308_s16 = scalar_lea.vmem [#allocation8], %s889_s30  ;;  %s740_s11 = sshll.u32 %s736_s13, 4  ;;  %s741_s11 = int_to_ptr.hbm [resolvable:$true] %s740_s11 }
 0x573   : > { %s738_s17 = sshll.u32 %s308_s16, 4  ;;  %s721_s25 = scalar_lea.sflag [#allocation4], %s1382_s1  ;;  %s739_s17 = int_to_ptr.vmem [resolvable:$true] %s738_s17 }
 0x574   : > { %s1169_s19 = sshra.s32 %s741_s11, 4  ;;  %s1175_s12 = scalar_lea.hbm %s1516_s5, 16  ;;  %s1170_s19 = int_to_ptr.hbm [resolvable:$true] %s1169_s19 }
 0x575   : > { %s1171_s14 = scalar_lea.hbm %s1170_s19, 8  ;;  %p1176_p5 = scmp.lt.s32.totalorder %s1170_s19, %s1516_s5 }
 0x576   : > { %p1172_p12 = scmp.ne.s32.totalorder %s1170_s19, %s1171_s14  ;;  %p1177_p7 = scmp.lt.s32.totalorder %s1175_s12, %s1171_s14 }
 0x578   : > { %p1173_p13 = pnand %p1172_p12, %p1349_p3  ;;  %p1178_p1 = por %p1177_p7, %p1176_p5 }
 0x57a   : > { %p1174_p0 = pneg %p1173_p13 }
 0x57c   : > { %p1179_p4 = pnand %p1178_p1, %p1174_p0 }
 0x5ea   : > { %v715_v18 = vpop.f32.mrf.mxu1 }
 0x5eb   : > { %v716_v19 = vadd.f32 %v1020_v15, %v715_v18 }
 0x5ed   : > { %719 = vst.msk [vmem:[%s308_s16] sm:$0xff] %vm349_vm0, %v716_v19 }
 0x5ee   : > { %1182 = shalt.err (!%p1179_p4)
}
 0x5ef   : > { %948 = dma.vmem_to_hbm [thread:$0]  (%p1349_p3), %s739_s17, 128, %s741_s11, %s721_s25  }
 0x5f2   : > { %v717_v20 = vpop.f32.mrf.mxu1 }
 0x5f3 PF: > { %s769_s1 = sand.u32 1, %s1217_s21   ;;  %p1531_p8 = scmp.ge.s32.totalorder %s1229_s24, 2 }
 0x5f4   : > { %s770_s30 = scalar_lea.sflag [#allocation4], %s769_s1 }
 0x5f5   : > { %p964_p11 = pnand %p1531_p8, %p1312_p6 }
 0x5f7   : > { %p965_p9 = pneg %p964_p11 }
 0x5f9   : > { %1208 = dma.done.wait (%p965_p9), %s770_s30, 128  }
 0x5fa   : > { %1210 = vsyncadd (%p965_p9), %s770_s30, 4294967168  ;;  %s780_s7 = scalar_lea.sflag [#allocation10], %s769_s1 }
 0x5fb   : > { %1212 = dma.done.wait (%p965_p9), %s780_s7, 512  }
 0x5fc   : > { %1214 = vsyncadd (%p965_p9), %s780_s7, 4294966784  ;;  %p24_p3 = scmp.ge.s32.totalorder %s1339_s18, 4   ;;  %s1532_s21 = smov %s1221_s22 }
 0x5fd   : > { %s1533_s22 = smov %s1225_s23  ;;  %s1534_s23 = smov %s1355_s29 }
 0x5fe   : > { %s1535_s24 = smov %s1339_s18  ;;  %26 = sbr.rel (!%p24_p3) target bundleno = 11 (0xb), region = 110 }
 0x603   :  { %786 = vsyncpa [#allocation3], 1 }
 0x604   :  { %788 = vsyncpa [#allocation3 + $0x1], 1 }
 0x605   :  { %789 = vsyncpa [#allocation6], 1 }
 0x606   :  { %790 = vsyncpa [#allocation4], 1 }
 0x607   :  { %792 = vsyncpa [#allocation4 + $0x1], 1 }
 0x608   :  { %793 = vsyncpa [#allocation10], 1 }
 0x609   :  { %795 = vsyncpa [#allocation10 + $0x1], 1 }

</bundles_post_ra>
